<compile_context>
chip_gen: v5e
topology: v5e:2x2
jax: 0.10.0
libtpu: 0.0.40
codegen_flags: <defaults>
</compile_context>

<pallas_src>
import jax
import jax.numpy as jnp
from jax import lax
from jax.experimental import pallas as pl
from jax.experimental.pallas import tpu as pltpu

N_NODES = 16
NUM_FEATURES = 8
HIDDEN = 32
NUM_CLASSES = 4


def graph_gat_kernel(x_ref, adj_ref, w_ref, v_ref, out_ref):
    x = x_ref[...]                       # [N, F]
    adj = adj_ref[...]                   # [N, N]
    mask = adj > 0

    def gat_layer(h_in, w, a_src, a_dst, b):
        # Linear projection: [N, Fin] @ [Fin, H] -> [N, H]   (MXU)
        h = jnp.dot(h_in, w, preferred_element_type=jnp.float32)
        # Source-node logits as a row [1, N] (MXU matrix-vector, contraction over H).
        alpha_src_row = lax.dot_general(
            a_src, h, (((1,), (1,)), ((), ())), preferred_element_type=jnp.float32)
        # Target-node logits as a column [N, 1] on the VPU (mul + lane reduce).
        alpha_dst_col = jnp.sum(h * a_dst, axis=-1, keepdims=True)
        e = alpha_dst_col + alpha_src_row                   # e[i, j]
        e = jnp.where(e > 0, e, 0.2 * e)                    # LeakyReLU(0.2)
        e = jnp.where(mask, e, jnp.float32(-1e30))
        e_max = jnp.max(e, axis=-1, keepdims=True)
        p = jnp.exp(e - e_max)                              # non-edges underflow to 0
        denom = jnp.sum(p, axis=-1, keepdims=True)          # >0: self-loops guarantee it
        att = p * pl.reciprocal(denom)                      # EUP, exact
        out = jnp.dot(att, h, preferred_element_type=jnp.float32) + b
        # F.normalize(p=2, dim=1): out / max(||out||, 1e-12) == out * rsqrt(max(ss, 1e-24))
        ss = jnp.sum(out * out, axis=-1, keepdims=True)
        out = out * lax.rsqrt(jnp.maximum(ss, 1e-24))
        return jnp.maximum(out, 0.0)                        # ReLU

    F, H = NUM_FEATURES, HIDDEN
    # Weight slab rows: [w1 (F) | w2 (H) | w3 (H) | lw1 (H) | lw2 (H) | lw3 (H)]
    w1 = w_ref[0:F, :]
    w2 = w_ref[F:F + H, :]
    w3 = w_ref[F + H:F + 2 * H, :]
    lw1 = w_ref[F + 2 * H:F + 3 * H, :]     # [H, H], only first NUM_CLASSES lanes used
    lw2 = w_ref[F + 3 * H:F + 4 * H, :]
    lw3 = w_ref[F + 4 * H:F + 5 * H, :]

    # Vector slab rows: as1 ad1 b1 as2 ad2 b2 as3 ad3 b3 lb(pad)
    o1 = gat_layer(x, w1, v_ref[0:1, :], v_ref[1:2, :], v_ref[2:3, :])
    o2 = gat_layer(o1, w2, v_ref[3:4, :], v_ref[4:5, :], v_ref[5:6, :])
    o3 = gat_layer(o2, w3, v_ref[6:7, :], v_ref[7:8, :], v_ref[8:9, :])
    lb = v_ref[9:10, :]

    # torch.cat(dim=1) + global_mean_pool(batch=None) == per-layer node-mean, then the
    # concatenated [1, 3H] row; fold the concat into per-layer matmuls against lw slices.
    p1 = jnp.mean(o1, axis=0, keepdims=True)                # [1, H]
    p2 = jnp.mean(o2, axis=0, keepdims=True)
    p3 = jnp.mean(o3, axis=0, keepdims=True)
    logits = (jnp.dot(p1, lw1, preferred_element_type=jnp.float32)
              + jnp.dot(p2, lw2, preferred_element_type=jnp.float32)
              + jnp.dot(p3, lw3, preferred_element_type=jnp.float32)
              + lb)                                         # [1, H]; lanes >= 4 are zero
    out_ref[...] = logits[:, :NUM_CLASSES]


@jax.jit
def graph_gat_forward(x, adj, wslab, vslab):
    vmem = pltpu.MemorySpace.VMEM
    return pl.pallas_call(
        graph_gat_kernel,
        out_shape=jax.ShapeDtypeStruct((1, NUM_CLASSES), jnp.float32),
        in_specs=[pl.BlockSpec(memory_space=vmem)] * 4,
        out_specs=pl.BlockSpec(memory_space=vmem),
    )(x, adj, wslab, vslab)


def pack_params(params):
    """Pack the 14 parameter tensors into two VMEM-friendly slabs (done once, host side)."""
    H = HIDDEN
    lw_pad = jnp.zeros((3 * H, H), jnp.float32).at[:, :NUM_CLASSES].set(params["lw"])
    wslab = jnp.concatenate(
        [params["w1"], params["w2"], params["w3"], lw_pad], axis=0)      # [168, 32]
    lb_pad = jnp.zeros((1, H), jnp.float32).at[:, :NUM_CLASSES].set(params["lb"])
    vslab = jnp.concatenate(
        [params["as1"], params["ad1"], params["b1"],
         params["as2"], params["ad2"], params["b2"],
         params["as3"], params["ad3"], params["b3"], lb_pad], axis=0)    # [10, 32]
    return wslab, vslab


def _reference(x, adj, params):
    """Pure-JAX reference of the same math, for correctness checking."""
    def layer(h_in, w, a_src, a_dst, b):
        h = h_in @ w
        a_s = (h * a_src).sum(-1)
        a_d = (h * a_dst).sum(-1)
        e = a_d[:, None] + a_s[None, :]
        e = jnp.where(e > 0, e, 0.2 * e)
        mask = adj > 0
        e = jnp.where(mask, e, -1e30)
        p = jnp.where(mask, jnp.exp(e - e.max(-1, keepdims=True)), 0.0)
        att = p / p.sum(-1, keepdims=True)
        out = att @ h + b
        out = out / jnp.maximum(jnp.linalg.norm(out, axis=1, keepdims=True), 1e-12)
        return jnp.maximum(out, 0.0)
    o1 = layer(x, params["w1"], params["as1"], params["ad1"], params["b1"])
    o2 = layer(o1, params["w2"], params["as2"], params["ad2"], params["b2"])
    o3 = layer(o2, params["w3"], params["as3"], params["ad3"], params["b3"])
    stack = jnp.concatenate([o1, o2, o3], axis=1)
    pooled = stack.mean(axis=0, keepdims=True)
    return pooled @ params["lw"] + params["lb"]


def _make_params(key):
    ks = jax.random.split(key, 16)
    s = 0.1
    p = {}
    p["w1"] = jax.random.normal(ks[0], (NUM_FEATURES, HIDDEN), jnp.float32) * s
    p["as1"] = jax.random.normal(ks[1], (1, HIDDEN), jnp.float32) * s
    p["ad1"] = jax.random.normal(ks[2], (1, HIDDEN), jnp.float32) * s
    p["b1"] = jax.random.normal(ks[3], (1, HIDDEN), jnp.float32) * s
    p["w2"] = jax.random.normal(ks[4], (HIDDEN, HIDDEN), jnp.float32) * s
    p["as2"] = jax.random.normal(ks[5], (1, HIDDEN), jnp.float32) * s
    p["ad2"] = jax.random.normal(ks[6], (1, HIDDEN), jnp.float32) * s
    p["b2"] = jax.random.normal(ks[7], (1, HIDDEN), jnp.float32) * s
    p["w3"] = jax.random.normal(ks[8], (HIDDEN, HIDDEN), jnp.float32) * s
    p["as3"] = jax.random.normal(ks[9], (1, HIDDEN), jnp.float32) * s
    p["ad3"] = jax.random.normal(ks[10], (1, HIDDEN), jnp.float32) * s
    p["b3"] = jax.random.normal(ks[11], (1, HIDDEN), jnp.float32) * s
    p["lw"] = jax.random.normal(ks[12], (3 * HIDDEN, NUM_CLASSES), jnp.float32) * s
    p["lb"] = jax.random.normal(ks[13], (1, NUM_CLASSES), jnp.float32) * s
    return p


def _make_graph(key):
    # Deterministic node features + a bidirectional ring graph (edge_index shape [2, 2N]).
    x = jax.random.normal(key, (N_NODES, NUM_FEATURES), jnp.float32)
    src = jnp.arange(N_NODES, dtype=jnp.int32)
    dst = (src + 1) % N_NODES
    edge_index = jnp.stack([jnp.concatenate([src, dst]),
                            jnp.concatenate([dst, src])])        # [2, 2N]
    # Dense adjacency: adj[target, source] = 1; add self-loops (GATConv default).
    adj = jnp.zeros((N_NODES, N_NODES), jnp.float32)
    adj = adj.at[edge_index[1], edge_index[0]].set(1.0)
    adj = jnp.maximum(adj, jnp.eye(N_NODES, dtype=jnp.float32))
    return x, edge_index, adj


if __name__ == "__main__":
    key = jax.random.PRNGKey(0)
    k_graph, k_params = jax.random.split(key)
    x, edge_index, adj = _make_graph(k_graph)
    params = _make_params(k_params)
    wslab, vslab = pack_params(params)

    out = graph_gat_forward(x, adj, wslab, vslab)
    out = jax.block_until_ready(out)

    ref = _reference(x, adj, params)
    assert out.shape == (1, NUM_CLASSES)
    assert jnp.allclose(out, ref, rtol=1e-4, atol=1e-5), (out, ref)

    print("KERNEL_OK")
</pallas_src>

<mosaic_0001>
module attributes {stable_mosaic.version = 11 : i64} {
  func.func @graph_gat_kernel(%arg0: memref<16x8xf32, #tpu.memory_space<vmem>>, %arg1: memref<16x16xf32, #tpu.memory_space<vmem>>, %arg2: memref<168x32xf32, #tpu.memory_space<vmem>>, %arg3: memref<10x32xf32, #tpu.memory_space<vmem>>, %arg4: memref<1x4xf32, #tpu.memory_space<vmem>>) attributes {dimension_semantics = [], scalar_prefetch = 0 : i64, scratch_operands = 0 : i64, tpu.core_type = #tpu.core_type<tc>} {
    %c0 = arith.constant 0 : index
    %c0_0 = arith.constant 0 : index
    %0 = vector.load %arg0[%c0, %c0_0] : memref<16x8xf32, #tpu.memory_space<vmem>>, vector<16x8xf32>
    %c0_1 = arith.constant 0 : index
    %c0_2 = arith.constant 0 : index
    %1 = vector.load %arg1[%c0_1, %c0_2] : memref<16x16xf32, #tpu.memory_space<vmem>>, vector<16x16xf32>
    %cst = arith.constant 0.000000e+00 : f32
    %2 = vector.broadcast %cst : f32 to vector<16x16xf32>
    %3 = arith.cmpf ogt, %1, %2 : vector<16x16xf32>
    %c0_3 = arith.constant 0 : index
    %c0_4 = arith.constant 0 : index
    %4 = vector.load %arg2[%c0_3, %c0_4] : memref<168x32xf32, #tpu.memory_space<vmem>>, vector<8x32xf32>
    %c8 = arith.constant 8 : index
    %c0_5 = arith.constant 0 : index
    %5 = vector.load %arg2[%c8, %c0_5] : memref<168x32xf32, #tpu.memory_space<vmem>>, vector<32x32xf32>
    %c40 = arith.constant 40 : index
    %c0_6 = arith.constant 0 : index
    %6 = vector.load %arg2[%c40, %c0_6] : memref<168x32xf32, #tpu.memory_space<vmem>>, vector<32x32xf32>
    %c72 = arith.constant 72 : index
    %c0_7 = arith.constant 0 : index
    %7 = vector.load %arg2[%c72, %c0_7] : memref<168x32xf32, #tpu.memory_space<vmem>>, vector<32x32xf32>
    %c104 = arith.constant 104 : index
    %c0_8 = arith.constant 0 : index
    %8 = vector.load %arg2[%c104, %c0_8] : memref<168x32xf32, #tpu.memory_space<vmem>>, vector<32x32xf32>
    %c136 = arith.constant 136 : index
    %c0_9 = arith.constant 0 : index
    %9 = vector.load %arg2[%c136, %c0_9] : memref<168x32xf32, #tpu.memory_space<vmem>>, vector<32x32xf32>
    %c0_10 = arith.constant 0 : index
    %c0_11 = arith.constant 0 : index
    %10 = vector.load %arg3[%c0_10, %c0_11] : memref<10x32xf32, #tpu.memory_space<vmem>>, vector<1x32xf32>
    %c1 = arith.constant 1 : index
    %c0_12 = arith.constant 0 : index
    %11 = vector.load %arg3[%c1, %c0_12] : memref<10x32xf32, #tpu.memory_space<vmem>>, vector<1x32xf32>
    %c2 = arith.constant 2 : index
    %c0_13 = arith.constant 0 : index
    %12 = vector.load %arg3[%c2, %c0_13] : memref<10x32xf32, #tpu.memory_space<vmem>>, vector<1x32xf32>
    %cst_14 = arith.constant dense<0.000000e+00> : vector<16x32xf32>
    %13 = tpu.matmul %0, %4, %cst_14 {dimension_numbers = #tpu.dot_dimension_numbers<[1], [0], [0], [1], [0, 0, 1, 1], [], []>} : vector<16x8xf32>, vector<8x32xf32>, vector<16x32xf32> -> vector<16x32xf32>
    %cst_15 = arith.constant dense<0.000000e+00> : vector<1x16xf32>
    %14 = tpu.matmul %10, %13, %cst_15 {dimension_numbers = #tpu.dot_dimension_numbers<[1], [1], [0], [0], [0, 0, 1, 0], [], []>} : vector<1x32xf32>, vector<16x32xf32>, vector<1x16xf32> -> vector<1x16xf32>
    %15 = vector.broadcast %11 : vector<1x32xf32> to vector<16x32xf32>
    %16 = arith.mulf %13, %15 : vector<16x32xf32>
    %cst_16 = arith.constant dense<0.000000e+00> : vector<16xf32>
    %17 = vector.multi_reduction <add>, %16, %cst_16 [1] : vector<16x32xf32> to vector<16xf32>
    %18 = vector.shape_cast %17 : vector<16xf32> to vector<16x1xf32>
    %19 = vector.broadcast %18 : vector<16x1xf32> to vector<16x16xf32>
    %20 = vector.broadcast %14 : vector<1x16xf32> to vector<16x16xf32>
    %21 = arith.addf %19, %20 : vector<16x16xf32>
    %cst_17 = arith.constant 0.000000e+00 : f32
    %22 = vector.broadcast %cst_17 : f32 to vector<16x16xf32>
    %23 = arith.cmpf ogt, %21, %22 : vector<16x16xf32>
    %cst_18 = arith.constant 2.000000e-01 : f32
    %24 = vector.broadcast %cst_18 : f32 to vector<16x16xf32>
    %25 = arith.mulf %24, %21 : vector<16x16xf32>
    %26 = arith.select %23, %21, %25 : vector<16x16xi1>, vector<16x16xf32>
    %cst_19 = arith.constant -1.000000e+30 : f32
    %27 = vector.broadcast %cst_19 : f32 to vector<16x16xf32>
    %28 = arith.select %3, %26, %27 : vector<16x16xi1>, vector<16x16xf32>
    %cst_20 = arith.constant dense<0xFF800000> : vector<16xf32>
    %29 = vector.multi_reduction <maximumf>, %28, %cst_20 [1] : vector<16x16xf32> to vector<16xf32>
    %30 = vector.shape_cast %29 : vector<16xf32> to vector<16x1xf32>
    %31 = vector.broadcast %30 : vector<16x1xf32> to vector<16x16xf32>
    %32 = arith.subf %28, %31 : vector<16x16xf32>
    %33 = math.exp %32 : vector<16x16xf32>
    %cst_21 = arith.constant dense<0.000000e+00> : vector<16xf32>
    %34 = vector.multi_reduction <add>, %33, %cst_21 [1] : vector<16x16xf32> to vector<16xf32>
    %35 = vector.shape_cast %34 : vector<16xf32> to vector<16x1xf32>
    %36 = tpu.reciprocal %35 : vector<16x1xf32> -> vector<16x1xf32>
    %37 = vector.broadcast %36 : vector<16x1xf32> to vector<16x16xf32>
    %38 = arith.mulf %33, %37 : vector<16x16xf32>
    %cst_22 = arith.constant dense<0.000000e+00> : vector<16x32xf32>
    %39 = tpu.matmul %38, %13, %cst_22 {dimension_numbers = #tpu.dot_dimension_numbers<[1], [0], [0], [1], [0, 0, 1, 1], [], []>} : vector<16x16xf32>, vector<16x32xf32>, vector<16x32xf32> -> vector<16x32xf32>
    %40 = vector.broadcast %12 : vector<1x32xf32> to vector<16x32xf32>
    %41 = arith.addf %39, %40 : vector<16x32xf32>
    %42 = arith.mulf %41, %41 : vector<16x32xf32>
    %cst_23 = arith.constant dense<0.000000e+00> : vector<16xf32>
    %43 = vector.multi_reduction <add>, %42, %cst_23 [1] : vector<16x32xf32> to vector<16xf32>
    %44 = vector.shape_cast %43 : vector<16xf32> to vector<16x1xf32>
    %cst_24 = arith.constant 1.000000e-24 : f32
    %45 = vector.broadcast %cst_24 : f32 to vector<16x1xf32>
    %46 = arith.maximumf %44, %45 : vector<16x1xf32>
    %47 = math.rsqrt %46 : vector<16x1xf32>
    %48 = vector.broadcast %47 : vector<16x1xf32> to vector<16x32xf32>
    %49 = arith.mulf %41, %48 : vector<16x32xf32>
    %cst_25 = arith.constant 0.000000e+00 : f32
    %50 = vector.broadcast %cst_25 : f32 to vector<16x32xf32>
    %51 = arith.maximumf %49, %50 : vector<16x32xf32>
    %c3 = arith.constant 3 : index
    %c0_26 = arith.constant 0 : index
    %52 = vector.load %arg3[%c3, %c0_26] : memref<10x32xf32, #tpu.memory_space<vmem>>, vector<1x32xf32>
    %c4 = arith.constant 4 : index
    %c0_27 = arith.constant 0 : index
    %53 = vector.load %arg3[%c4, %c0_27] : memref<10x32xf32, #tpu.memory_space<vmem>>, vector<1x32xf32>
    %c5 = arith.constant 5 : index
    %c0_28 = arith.constant 0 : index
    %54 = vector.load %arg3[%c5, %c0_28] : memref<10x32xf32, #tpu.memory_space<vmem>>, vector<1x32xf32>
    %cst_29 = arith.constant dense<0.000000e+00> : vector<16x32xf32>
    %55 = tpu.matmul %51, %5, %cst_29 {dimension_numbers = #tpu.dot_dimension_numbers<[1], [0], [0], [1], [0, 0, 1, 1], [], []>} : vector<16x32xf32>, vector<32x32xf32>, vector<16x32xf32> -> vector<16x32xf32>
    %cst_30 = arith.constant dense<0.000000e+00> : vector<1x16xf32>
    %56 = tpu.matmul %52, %55, %cst_30 {dimension_numbers = #tpu.dot_dimension_numbers<[1], [1], [0], [0], [0, 0, 1, 0], [], []>} : vector<1x32xf32>, vector<16x32xf32>, vector<1x16xf32> -> vector<1x16xf32>
    %57 = vector.broadcast %53 : vector<1x32xf32> to vector<16x32xf32>
    %58 = arith.mulf %55, %57 : vector<16x32xf32>
    %cst_31 = arith.constant dense<0.000000e+00> : vector<16xf32>
    %59 = vector.multi_reduction <add>, %58, %cst_31 [1] : vector<16x32xf32> to vector<16xf32>
    %60 = vector.shape_cast %59 : vector<16xf32> to vector<16x1xf32>
    %61 = vector.broadcast %60 : vector<16x1xf32> to vector<16x16xf32>
    %62 = vector.broadcast %56 : vector<1x16xf32> to vector<16x16xf32>
    %63 = arith.addf %61, %62 : vector<16x16xf32>
    %cst_32 = arith.constant 0.000000e+00 : f32
    %64 = vector.broadcast %cst_32 : f32 to vector<16x16xf32>
    %65 = arith.cmpf ogt, %63, %64 : vector<16x16xf32>
    %cst_33 = arith.constant 2.000000e-01 : f32
    %66 = vector.broadcast %cst_33 : f32 to vector<16x16xf32>
    %67 = arith.mulf %66, %63 : vector<16x16xf32>
    %68 = arith.select %65, %63, %67 : vector<16x16xi1>, vector<16x16xf32>
    %cst_34 = arith.constant -1.000000e+30 : f32
    %69 = vector.broadcast %cst_34 : f32 to vector<16x16xf32>
    %70 = arith.select %3, %68, %69 : vector<16x16xi1>, vector<16x16xf32>
    %cst_35 = arith.constant dense<0xFF800000> : vector<16xf32>
    %71 = vector.multi_reduction <maximumf>, %70, %cst_35 [1] : vector<16x16xf32> to vector<16xf32>
    %72 = vector.shape_cast %71 : vector<16xf32> to vector<16x1xf32>
    %73 = vector.broadcast %72 : vector<16x1xf32> to vector<16x16xf32>
    %74 = arith.subf %70, %73 : vector<16x16xf32>
    %75 = math.exp %74 : vector<16x16xf32>
    %cst_36 = arith.constant dense<0.000000e+00> : vector<16xf32>
    %76 = vector.multi_reduction <add>, %75, %cst_36 [1] : vector<16x16xf32> to vector<16xf32>
    %77 = vector.shape_cast %76 : vector<16xf32> to vector<16x1xf32>
    %78 = tpu.reciprocal %77 : vector<16x1xf32> -> vector<16x1xf32>
    %79 = vector.broadcast %78 : vector<16x1xf32> to vector<16x16xf32>
    %80 = arith.mulf %75, %79 : vector<16x16xf32>
    %cst_37 = arith.constant dense<0.000000e+00> : vector<16x32xf32>
    %81 = tpu.matmul %80, %55, %cst_37 {dimension_numbers = #tpu.dot_dimension_numbers<[1], [0], [0], [1], [0, 0, 1, 1], [], []>} : vector<16x16xf32>, vector<16x32xf32>, vector<16x32xf32> -> vector<16x32xf32>
    %82 = vector.broadcast %54 : vector<1x32xf32> to vector<16x32xf32>
    %83 = arith.addf %81, %82 : vector<16x32xf32>
    %84 = arith.mulf %83, %83 : vector<16x32xf32>
    %cst_38 = arith.constant dense<0.000000e+00> : vector<16xf32>
    %85 = vector.multi_reduction <add>, %84, %cst_38 [1] : vector<16x32xf32> to vector<16xf32>
    %86 = vector.shape_cast %85 : vector<16xf32> to vector<16x1xf32>
    %cst_39 = arith.constant 1.000000e-24 : f32
    %87 = vector.broadcast %cst_39 : f32 to vector<16x1xf32>
    %88 = arith.maximumf %86, %87 : vector<16x1xf32>
    %89 = math.rsqrt %88 : vector<16x1xf32>
    %90 = vector.broadcast %89 : vector<16x1xf32> to vector<16x32xf32>
    %91 = arith.mulf %83, %90 : vector<16x32xf32>
    %cst_40 = arith.constant 0.000000e+00 : f32
    %92 = vector.broadcast %cst_40 : f32 to vector<16x32xf32>
    %93 = arith.maximumf %91, %92 : vector<16x32xf32>
    %c6 = arith.constant 6 : index
    %c0_41 = arith.constant 0 : index
    %94 = vector.load %arg3[%c6, %c0_41] : memref<10x32xf32, #tpu.memory_space<vmem>>, vector<1x32xf32>
    %c7 = arith.constant 7 : index
    %c0_42 = arith.constant 0 : index
    %95 = vector.load %arg3[%c7, %c0_42] : memref<10x32xf32, #tpu.memory_space<vmem>>, vector<1x32xf32>
    %c8_43 = arith.constant 8 : index
    %c0_44 = arith.constant 0 : index
    %96 = vector.load %arg3[%c8_43, %c0_44] : memref<10x32xf32, #tpu.memory_space<vmem>>, vector<1x32xf32>
    %cst_45 = arith.constant dense<0.000000e+00> : vector<16x32xf32>
    %97 = tpu.matmul %93, %6, %cst_45 {dimension_numbers = #tpu.dot_dimension_numbers<[1], [0], [0], [1], [0, 0, 1, 1], [], []>} : vector<16x32xf32>, vector<32x32xf32>, vector<16x32xf32> -> vector<16x32xf32>
    %cst_46 = arith.constant dense<0.000000e+00> : vector<1x16xf32>
    %98 = tpu.matmul %94, %97, %cst_46 {dimension_numbers = #tpu.dot_dimension_numbers<[1], [1], [0], [0], [0, 0, 1, 0], [], []>} : vector<1x32xf32>, vector<16x32xf32>, vector<1x16xf32> -> vector<1x16xf32>
    %99 = vector.broadcast %95 : vector<1x32xf32> to vector<16x32xf32>
    %100 = arith.mulf %97, %99 : vector<16x32xf32>
    %cst_47 = arith.constant dense<0.000000e+00> : vector<16xf32>
    %101 = vector.multi_reduction <add>, %100, %cst_47 [1] : vector<16x32xf32> to vector<16xf32>
    %102 = vector.shape_cast %101 : vector<16xf32> to vector<16x1xf32>
    %103 = vector.broadcast %102 : vector<16x1xf32> to vector<16x16xf32>
    %104 = vector.broadcast %98 : vector<1x16xf32> to vector<16x16xf32>
    %105 = arith.addf %103, %104 : vector<16x16xf32>
    %cst_48 = arith.constant 0.000000e+00 : f32
    %106 = vector.broadcast %cst_48 : f32 to vector<16x16xf32>
    %107 = arith.cmpf ogt, %105, %106 : vector<16x16xf32>
    %cst_49 = arith.constant 2.000000e-01 : f32
    %108 = vector.broadcast %cst_49 : f32 to vector<16x16xf32>
    %109 = arith.mulf %108, %105 : vector<16x16xf32>
    %110 = arith.select %107, %105, %109 : vector<16x16xi1>, vector<16x16xf32>
    %cst_50 = arith.constant -1.000000e+30 : f32
    %111 = vector.broadcast %cst_50 : f32 to vector<16x16xf32>
    %112 = arith.select %3, %110, %111 : vector<16x16xi1>, vector<16x16xf32>
    %cst_51 = arith.constant dense<0xFF800000> : vector<16xf32>
    %113 = vector.multi_reduction <maximumf>, %112, %cst_51 [1] : vector<16x16xf32> to vector<16xf32>
    %114 = vector.shape_cast %113 : vector<16xf32> to vector<16x1xf32>
    %115 = vector.broadcast %114 : vector<16x1xf32> to vector<16x16xf32>
    %116 = arith.subf %112, %115 : vector<16x16xf32>
    %117 = math.exp %116 : vector<16x16xf32>
    %cst_52 = arith.constant dense<0.000000e+00> : vector<16xf32>
    %118 = vector.multi_reduction <add>, %117, %cst_52 [1] : vector<16x16xf32> to vector<16xf32>
    %119 = vector.shape_cast %118 : vector<16xf32> to vector<16x1xf32>
    %120 = tpu.reciprocal %119 : vector<16x1xf32> -> vector<16x1xf32>
    %121 = vector.broadcast %120 : vector<16x1xf32> to vector<16x16xf32>
    %122 = arith.mulf %117, %121 : vector<16x16xf32>
    %cst_53 = arith.constant dense<0.000000e+00> : vector<16x32xf32>
    %123 = tpu.matmul %122, %97, %cst_53 {dimension_numbers = #tpu.dot_dimension_numbers<[1], [0], [0], [1], [0, 0, 1, 1], [], []>} : vector<16x16xf32>, vector<16x32xf32>, vector<16x32xf32> -> vector<16x32xf32>
    %124 = vector.broadcast %96 : vector<1x32xf32> to vector<16x32xf32>
    %125 = arith.addf %123, %124 : vector<16x32xf32>
    %126 = arith.mulf %125, %125 : vector<16x32xf32>
    %cst_54 = arith.constant dense<0.000000e+00> : vector<16xf32>
    %127 = vector.multi_reduction <add>, %126, %cst_54 [1] : vector<16x32xf32> to vector<16xf32>
    %128 = vector.shape_cast %127 : vector<16xf32> to vector<16x1xf32>
    %cst_55 = arith.constant 1.000000e-24 : f32
    %129 = vector.broadcast %cst_55 : f32 to vector<16x1xf32>
    %130 = arith.maximumf %128, %129 : vector<16x1xf32>
    %131 = math.rsqrt %130 : vector<16x1xf32>
    %132 = vector.broadcast %131 : vector<16x1xf32> to vector<16x32xf32>
    %133 = arith.mulf %125, %132 : vector<16x32xf32>
    %cst_56 = arith.constant 0.000000e+00 : f32
    %134 = vector.broadcast %cst_56 : f32 to vector<16x32xf32>
    %135 = arith.maximumf %133, %134 : vector<16x32xf32>
    %c9 = arith.constant 9 : index
    %c0_57 = arith.constant 0 : index
    %136 = vector.load %arg3[%c9, %c0_57] : memref<10x32xf32, #tpu.memory_space<vmem>>, vector<1x32xf32>
    %cst_58 = arith.constant dense<0.000000e+00> : vector<32xf32>
    %137 = vector.multi_reduction <add>, %51, %cst_58 [0] : vector<16x32xf32> to vector<32xf32>
    %138 = vector.shape_cast %137 : vector<32xf32> to vector<1x32xf32>
    %cst_59 = arith.constant 1.600000e+01 : f32
    %139 = vector.broadcast %cst_59 : f32 to vector<1x32xf32>
    %140 = arith.divf %138, %139 : vector<1x32xf32>
    %cst_60 = arith.constant dense<0.000000e+00> : vector<32xf32>
    %141 = vector.multi_reduction <add>, %93, %cst_60 [0] : vector<16x32xf32> to vector<32xf32>
    %142 = vector.shape_cast %141 : vector<32xf32> to vector<1x32xf32>
    %cst_61 = arith.constant 1.600000e+01 : f32
    %143 = vector.broadcast %cst_61 : f32 to vector<1x32xf32>
    %144 = arith.divf %142, %143 : vector<1x32xf32>
    %cst_62 = arith.constant dense<0.000000e+00> : vector<32xf32>
    %145 = vector.multi_reduction <add>, %135, %cst_62 [0] : vector<16x32xf32> to vector<32xf32>
    %146 = vector.shape_cast %145 : vector<32xf32> to vector<1x32xf32>
    %cst_63 = arith.constant 1.600000e+01 : f32
    %147 = vector.broadcast %cst_63 : f32 to vector<1x32xf32>
    %148 = arith.divf %146, %147 : vector<1x32xf32>
    %cst_64 = arith.constant dense<0.000000e+00> : vector<1x32xf32>
    %149 = tpu.matmul %140, %7, %cst_64 {dimension_numbers = #tpu.dot_dimension_numbers<[1], [0], [0], [1], [0, 0, 1, 1], [], []>} : vector<1x32xf32>, vector<32x32xf32>, vector<1x32xf32> -> vector<1x32xf32>
    %cst_65 = arith.constant dense<0.000000e+00> : vector<1x32xf32>
    %150 = tpu.matmul %144, %8, %cst_65 {dimension_numbers = #tpu.dot_dimension_numbers<[1], [0], [0], [1], [0, 0, 1, 1], [], []>} : vector<1x32xf32>, vector<32x32xf32>, vector<1x32xf32> -> vector<1x32xf32>
    %151 = arith.addf %149, %150 : vector<1x32xf32>
    %cst_66 = arith.constant dense<0.000000e+00> : vector<1x32xf32>
    %152 = tpu.matmul %148, %9, %cst_66 {dimension_numbers = #tpu.dot_dimension_numbers<[1], [0], [0], [1], [0, 0, 1, 1], [], []>} : vector<1x32xf32>, vector<32x32xf32>, vector<1x32xf32> -> vector<1x32xf32>
    %153 = arith.addf %151, %152 : vector<1x32xf32>
    %154 = arith.addf %153, %136 : vector<1x32xf32>
    %155 = vector.extract_strided_slice %154 {offsets = [0, 0], sizes = [1, 4], strides = [1, 1]} : vector<1x32xf32> to vector<1x4xf32>
    %c0_67 = arith.constant 0 : index
    %c0_68 = arith.constant 0 : index
    %156 = vector.load %arg4[%c0_67, %c0_68] : memref<1x4xf32, #tpu.memory_space<vmem>>, vector<1x4xf32>
    tpu.vector_store %arg4[%c0_67, %c0_68], %155 {strides = array<i32>} : memref<1x4xf32, #tpu.memory_space<vmem>>, vector<1x4xf32>,
    return
  }
}

</mosaic_0001>

<bundles_post_ra>
// kernel: graph_gat_forward.1
= control target key start
LH: loop header
LB: loop body
LE: loop exit
PB: predicated region body
PF: predicated region fallthrough
CT: control target
= control target key end

     0   :  { %vm48_vm0 = vcmask 64512   ;;  %s1064_s0 = inlined_call_operand.vmem [shape: f32[16,8], index: 0, kind: input, shape index: {}]   ;;  %s1065_s1 = inlined_call_operand.vmem [shape: f32[16,16], index: 1, kind: input, shape index: {}]   ;;  %s1066_s2 = inlined_call_operand.vmem [shape: f32[168,32], index: 2, kind: input, shape index: {}]   ;;  %s1067_s3 = inlined_call_operand.vmem [shape: f32[10,32], index: 3, kind: input, shape index: {}]   ;;  %s1068_s4 = inlined_call_operand.hbm [shape: f32[1,4], index: 4, kind: output, shape index: {}]  }
   0x1   :  { %v24_v0 = vld [vmem:[%s1066_s2] sm:$0xff] }
   0x2   :  { %v18_v1 = vld [vmem:[%s1064_s0] sm:$0xff]  ;;  %70 = vmatpush.msra.mxu0 %v24_v0 }
   0x3   :  { %754 = vmatmul.msk.f32.vlgmr.msra.gmra.mxu0 %vm48_vm0, %v18_v1 }
   0x4   :  { %9 = vsyncpa [#allocation3], 0  ;;  %v19_v2 = vld [vmem:[%s1064_s0 + $0x8] sm:$0xff]  ;;  %v780_v3 = vld [vmem:[%s1067_s3 + $0x1] ss:$0 sm:$0xff]  ;;  %vm78_vm1 = vcmask 261120  }
   0x5   :  { %v45_v10 = vld [vmem:[%s1067_s3] sm:$0x1]  ;;  %vm128_vm4 = vcmask 130048   ;;  %v908_v22 = vld [vmem:[%s1065_s1 + $0x8] sm:$0xff]  ;;  %v781_v61 = vld [vmem:[%s1067_s3 + $0x2] ss:$0 sm:$0xff] }
   0x6   :  { %v900_v15 = vld [vmem:[%s1065_s1] sm:$0xff]  ;;  %vm23_vm6 = vcmp.gt.f32.partialorder %v908_v22, 0.0  ;;  %s851_s27 = smov [#allocation2]   ;;  %s745_s30 = sshll.u32 %s1068_s4, 4  ;;  %s746_s30 = int_to_ptr.hbm [resolvable:$true] %s745_s30 }
   0x7   :  { %vm22_vm2 = vcmp.gt.f32.partialorder %v900_v15, 0.0  ;;  %s743_s1 = sshll.u32 %s851_s27, 4  ;;  %s744_s1 = int_to_ptr.vmem [resolvable:$true] %s743_s1 }
   0xb   :  { %755 = vmatmul.msk.f32.gmra.mxu0 %vm48_vm0, %v19_v2 }
  0x80   :  { %v72_v4 = vpop.f32.mrf.mxu0 }
  0x81   :  { %v109_v5 = vmul.f32 %v780_v3, %v72_v4 }
  0x83   :  { %v111_v6 = vsel %vm78_vm1, %v109_v5, 0.0 }
  0x84   :  { %112 = vadd.xlane.f32.xlu0 %v111_v6  ;;  %v28_v6 = vld [vmem:[%s1066_s2 + $0x20] sm:$0xff] }
  0x85   :  { %262 = vmatpush.msra.mxu3 %v28_v6  ;;  %v35_v6 = vld [vmem:[%s1066_s2 + $0x58] sm:$0xff] }
  0x88   :  { %v75_v7 = vpop.f32.mrf.mxu0 }
  0x89   :  { %756 = vmatpush.xpose.msk.msra.mxu1 %vm78_vm1, %v75_v7  ;;  %198 = vmatpush.msra.mxu2 %v75_v7  ;;  %v110_v8 = vmul.f32 %v780_v3, %v75_v7  ;;  %v27_v7 = vld [vmem:[%s1066_s2 + $0x18] sm:$0xff] }
  0x8a   :  { %263 = vmatpush.msra.mxu3 %v27_v7  ;;  %v34_v7 = vld [vmem:[%s1066_s2 + $0x50] sm:$0xff] }
  0x8b   :  { %199 = vmatpush.msra.mxu2 %v72_v4  ;;  %v114_v9 = vsel %vm78_vm1, %v110_v8, 0.0  ;;  %v26_v8 = vld [vmem:[%s1066_s2 + $0x10] sm:$0xff] }
  0x8c   :  { %115 = vadd.xlane.f32.xlu0 %v114_v9  ;;  %264 = vmatpush.msra.mxu3 %v26_v8  ;;  %v25_v9 = vld [vmem:[%s1066_s2 + $0x8] sm:$0xff] }
  0x8d   :  { %757 = vmatpush.xpose.msk.msra.mxu1 %vm78_vm1, %v72_v4 }
  0x8e   :  { %265 = vmatpush.msra.mxu3 %v25_v9  ;;  %v33_v9 = vld [vmem:[%s1066_s2 + $0x48] sm:$0xff] }
  0x90   :  { %758 = vmatmul.msk.f32.vlgmr.msra.gmra.mxu1 %vm78_vm1, %v45_v10 }
  0xf7   :  { %v113_v11 = vpop.xlane.xlu0 %112 }
  0xff   :  { %v116_v14 = vpop.xlane.xlu0 %115 }
 0x10d   :  { %v105_v12 = vpop.f32.mrf.mxu1 }
 0x10e   :  { %v117_v13 = vperm.slane %v105_v12, 0 }
 0x110   :  { %v118_v16 = vadd.f32 %v117_v13, %v113_v11  ;;  %v119_v17 = vadd.f32 %v117_v13, %v116_v14 }
 0x112   :  { %vm120_vm3 = vcmp.gt.f32.partialorder %v118_v16, 0.0  ;;  %v122_v18 = vmul.f32 0.2, %v118_v16  ;;  %v123_v20 = vmul.f32 0.2, %v119_v17  ;;  %vm121_vm5 = vcmp.gt.f32.partialorder %v119_v17, 0.0 }
 0x114   :  { %v124_v19 = vsel %vm120_vm3, %v118_v16, %v122_v18  ;;  %v125_v24 = vsel %vm121_vm5, %v119_v17, %v123_v20 }
 0x115   :  { %v126_v21 = vsel %vm22_vm2, %v124_v19, -1e+30  ;;  %v127_v25 = vsel %vm23_vm6, %v125_v24, -1e+30 }
 0x116   :  { %v129_v23 = vsel %vm128_vm4, %v126_v21, -inf  ;;  %v132_v26 = vsel %vm128_vm4, %v127_v25, -inf }
 0x117   :  { %130 = vmax.xlane.f32.xlu1 %v129_v23 }
 0x11f   :  { %133 = vmax.xlane.f32.xlu1 %v132_v26 }
 0x18a   :  { %v131_v27 = vpop.xlane.xlu1 %130 }
 0x18b   :  { %v135_v28 = vsub.f32 %v126_v21, %v131_v27 }
 0x18d   :  { %v137_v29 = vmul.f32 1.442695, %v135_v28 }
 0x18f   :  { %786 = vpow2.f32 %v137_v29 }
 0x192   :  { %v134_v30 = vpop.xlane.xlu1 %133 }
 0x193   :  { %v136_v31 = vsub.f32 %v127_v25, %v134_v30 }
 0x195   :  { %v787_v32 = vpop.eup %786  ;;  %v139_v33 = vmul.f32 1.442695, %v136_v31 }
 0x196   :  { %v141_v34 = vsel %vm128_vm4, %v787_v32, 0.0 }
 0x197   :  { %788 = vpow2.f32 %v139_v33  ;;  %142 = vadd.xlane.f32.xlu2 %v141_v34 }
 0x19d   :  { %v789_v35 = vpop.eup %788 }
 0x19e   :  { %v144_v36 = vsel %vm128_vm4, %v789_v35, 0.0 }
 0x19f   :  { %145 = vadd.xlane.f32.xlu2 %v144_v36 }
 0x20a   :  { %v143_v37 = vpop.xlane.xlu2 %142 }
 0x20b   :  { %790 = vrcp.f32 %v143_v37  ;;  %v158_v42 = vand.u32 2147483648, %v143_v37  ;;  %v156_v44 = vand.u32 2147483647, %v143_v37  ;;  %vm152_vm8 = vweird.f32 %v143_v37 }
 0x20d   :  { %v159_v47 = vor.u32 1.1754944e-38, %v158_v42  ;;  %vm157_vm10 = vcmp.eq.f32.partialorder %v156_v44, 8.507059e+37  ;;  %v241_v44 = vld [vmem:[%s1067_s3 + $0x3] sm:$0x1] }
 0x211   :  { %v791_v38 = vpop.eup %790 }
 0x212   :  { %v148_v39 = vmul.f32 %v791_v38, %v143_v37  ;;  %v146_v40 = vpop.xlane.xlu2 %145  ;;  %vm153_vm7 = vweird.f32 %v791_v38  ;;  %v782_v37 = vld [vmem:[%s1067_s3 + $0x4] ss:$0 sm:$0xff] }
 0x213   :  { %792 = vrcp.f32 %v146_v40  ;;  %vm154_vm9 = vmor %vm152_vm8, %vm153_vm7  ;;  %v172_v53 = vand.u32 2147483648, %v146_v40  ;;  %v170_v55 = vand.u32 2147483647, %v146_v40  ;;  %vm166_vm12 = vweird.f32 %v146_v40 }
 0x214   :  { %v149_v41 = vsub.f32 1.0, %v148_v39 }
 0x215   :  { %v173_v57 = vor.u32 1.1754944e-38, %v172_v53  ;;  %vm171_vm14 = vcmp.eq.f32.partialorder %v170_v55, 8.507059e+37 }
 0x216   :  { %v150_v43 = vmul.f32 %v791_v38, %v149_v41 }
 0x218   :  { %v151_v45 = vadd.f32 %v791_v38, %v150_v43 }
 0x219   :  { %v793_v46 = vpop.eup %792 }
 0x21a   :  { %v162_v48 = vmul.f32 %v793_v46, %v146_v40  ;;  %v155_v49 = vsel %vm154_vm9, %v791_v38, %v151_v45  ;;  %vm167_vm11 = vweird.f32 %v793_v46 }
 0x21b   :  { %v160_v50 = vsel %vm157_vm10, %v159_v47, %v155_v49  ;;  %vm168_vm13 = vmor %vm166_vm12, %vm167_vm11 }
 0x21c   :  { %v163_v51 = vsub.f32 1.0, %v162_v48  ;;  %v175_v52 = vmul.f32 %v787_v32, %v160_v50 }
 0x21e   :  { %v164_v54 = vmul.f32 %v793_v46, %v163_v51  ;;  %759 = vmatmul.msk.f32.vlgmr.msra.gmra.mxu2 %vm128_vm4, %v175_v52 }
 0x220   :  { %v165_v56 = vadd.f32 %v793_v46, %v164_v54 }
 0x222   :  { %v169_v58 = vsel %vm168_vm13, %v793_v46, %v165_v56 }
 0x223   :  { %v174_v59 = vsel %vm171_vm14, %v173_v57, %v169_v58 }
 0x224   :  { %v176_v60 = vmul.f32 %v789_v35, %v174_v59 }
 0x226   :  { %760 = vmatmul.msk.f32.gmra.mxu2 %vm128_vm4, %v176_v60 }
 0x2a1   :  { %v201_v62 = vpop.f32.mrf.mxu2 }
 0x2a2   :  { %v202_v63 = vadd.f32 %v781_v61, %v201_v62 }
 0x2a4   :  { %v207_v0 = vmul.f32 %v202_v63, %v202_v63 }
 0x2a6   :  { %v209_v1 = vsel %vm78_vm1, %v207_v0, 0.0 }
 0x2a7   :  { %210 = vadd.xlane.f32.xlu0 %v209_v1 }
 0x2a9   :  { %v204_v2 = vpop.f32.mrf.mxu2 }
 0x2aa   :  { %v205_v3 = vadd.f32 %v781_v61, %v204_v2 }
 0x2ac   :  { %v208_v4 = vmul.f32 %v205_v3, %v205_v3 }
 0x2ae   :  { %v212_v5 = vsel %vm78_vm1, %v208_v4, 0.0 }
 0x2af   :  { %213 = vadd.xlane.f32.xlu1 %v212_v5  ;;  %v36_v5 = vld [vmem:[%s1066_s2 + $0x60] sm:$0xff] }
 0x31a   :  { %v211_v10 = vpop.xlane.xlu0 %210 }
 0x31b   :  { %v215_v11 = vmax.f32 %v211_v10, 1e-24 }
 0x31d   :  { %794 = vrsqrt.f32 %v215_v11  ;;  %vm223_vm0 = vweird.f32 %v215_v11 }
 0x322   :  { %v214_v12 = vpop.xlane.xlu1 %213 }
 0x323   :  { %v795_v13 = vpop.eup %794  ;;  %v216_v14 = vmax.f32 %v214_v12, 1e-24 }
 0x324   :  { %v218_v16 = vmul.f32 %v795_v13, %v215_v11  ;;  %vm224_vm15 = vweird.f32 %v795_v13  ;;  %v850_v11 = vmov 16.0  }
 0x325   :  { %796 = vrsqrt.f32 %v216_v14  ;;  %vm225_vm3 = vmor %vm223_vm0, %vm224_vm15  ;;  %vm233_vm7 = vweird.f32 %v216_v14 }
 0x326   :  { %v219_v17 = vmul.f32 %v795_v13, %v218_v16 }
 0x328   :  { %v220_v18 = vmul.f32 0.5, %v219_v17 }
 0x32a   :  { %v221_v19 = vsub.f32 1.5, %v220_v18 }
 0x32b   :  { %v797_v20 = vpop.eup %796 }
 0x32c   :  { %v228_v21 = vmul.f32 %v797_v20, %v216_v14  ;;  %v222_v23 = vmul.f32 %v795_v13, %v221_v19  ;;  %vm234_vm5 = vweird.f32 %v797_v20 }
 0x32d   :  { %vm235_vm8 = vmor %vm233_vm7, %vm234_vm5 }
 0x32e   :  { %v229_v24 = vmul.f32 %v797_v20, %v228_v21  ;;  %v226_v25 = vsel %vm225_vm3, %v795_v13, %v222_v23 }
 0x32f   :  { %v237_v26 = vmul.f32 %v226_v25, %v202_v63 }
 0x330   :  { %v230_v27 = vmul.f32 0.5, %v229_v24 }
 0x331   :  { %v239_v28 = vmax.f32 %v237_v26, 0.0 }
 0x332   :  { %v231_v29 = vsub.f32 1.5, %v230_v27 }
 0x333   :  { %761 = vmatmul.msk.f32.vlgmr.msra.gmra.mxu3 %vm78_vm1, %v239_v28  ;;  %v628_v34 = vsel %vm78_vm1, %v239_v28, 0.0 }
 0x334   :  { %v232_v30 = vmul.f32 %v797_v20, %v231_v29 }
 0x336   :  { %v236_v31 = vsel %vm235_vm8, %v797_v20, %v232_v30 }
 0x337   :  { %v238_v32 = vmul.f32 %v236_v31, %v205_v3 }
 0x339   :  { %v240_v33 = vmax.f32 %v238_v32, 0.0 }
 0x33b   :  { %762 = vmatmul.msk.f32.gmra.mxu3 %vm78_vm1, %v240_v33  ;;  %v629_v35 = vsel %vm78_vm1, %v240_v33, 0.0 }
 0x33c   :  { %v940_v36 = vadd.f32 %v629_v35, %v628_v34 }
 0x33e   :  { %v631_v17 = vrot.slane %v940_v36, 4 }
 0x340   :  { %v632_v26 = vadd.f32 %v631_v17, %v940_v36 }
 0x342   :  { %v633_v34 = vrot.slane %v632_v26, 2 }
 0x3b6   :  { %v267_v38 = vpop.f32.mrf.mxu3 }
 0x3b7   :  { %v303_v39 = vmul.f32 %v782_v37, %v267_v38 }
 0x3b9   :  { %v305_v40 = vsel %vm78_vm1, %v303_v39, 0.0 }
 0x3ba   :  { %306 = vadd.xlane.f32.xlu2 %v305_v40  ;;  %v634_v40 = vadd.f32 %v633_v34, %v632_v26 }
 0x3be   :  { %v270_v41 = vpop.f32.mrf.mxu3 }
 0x3bf   :  { %763 = vmatpush.xpose.msk.msrb.mxu1 %vm78_vm1, %v270_v41  ;;  %391 = vmatpush.msrb.mxu0 %v270_v41  ;;  %v304_v42 = vmul.f32 %v782_v37, %v270_v41 }
 0x3c1   :  { %392 = vmatpush.msrb.mxu0 %v267_v38  ;;  %v308_v43 = vsel %vm78_vm1, %v304_v42, 0.0 }
 0x3c2   :  { %309 = vadd.xlane.f32.xlu0 %v308_v43  ;;  %v635_v43 = vrot.slane %v634_v40, 1 }
 0x3c3   :  { %764 = vmatpush.xpose.msk.msrb.mxu1 %vm78_vm1, %v267_v38  ;;  %703 = vmatpush.msra.mxu0 %v36_v5 }
 0x3c5   :  { %704 = vmatpush.msra.mxu0 %v35_v6 }
 0x3c6   :  { %765 = vmatmul.msk.f32.vlgmr.msrb.gmra.mxu1 %vm78_vm1, %v241_v44 }
 0x3c7   :  { %705 = vmatpush.msra.mxu0 %v34_v7 }
 0x3c9   :  { %706 = vmatpush.msra.mxu0 %v33_v9 }
 0x42d   :  { %v307_v47 = vpop.xlane.xlu2 %306 }
 0x435   :  { %v310_v48 = vpop.xlane.xlu0 %309 }
 0x443   :  { %v299_v45 = vpop.f32.mrf.mxu1 }
 0x444   :  { %v311_v46 = vperm.slane %v299_v45, 0 }
 0x446   :  { %v312_v49 = vadd.f32 %v311_v46, %v307_v47  ;;  %v313_v50 = vadd.f32 %v311_v46, %v310_v48  ;;  %v636_v46 = vadd.f32 %v635_v43, %v634_v40  ;;  %v38_v40 = vld [vmem:[%s1066_s2 + $0x70] sm:$0xff] }
 0x448   :  { %vm315_vm9 = vcmp.gt.f32.partialorder %v313_v50, 0.0  ;;  %v317_v51 = vmul.f32 0.2, %v313_v50  ;;  %vm314_vm10 = vcmp.gt.f32.partialorder %v312_v49, 0.0  ;;  %v316_v52 = vmul.f32 0.2, %v312_v49 }
 0x44a   :  { %v319_v53 = vsel %vm315_vm9, %v313_v50, %v317_v51  ;;  %v318_v54 = vsel %vm314_vm10, %v312_v49, %v316_v52  ;;  %v783_v49 = vld [vmem:[%s1067_s3 + $0x5] ss:$0 sm:$0xff] }
 0x44b   :  { %v321_v55 = vsel %vm23_vm6, %v319_v53, -1e+30  ;;  %v320_v56 = vsel %vm22_vm2, %v318_v54, -1e+30 }
 0x44c   :  { %v325_v57 = vsel %vm128_vm4, %v321_v55, -inf  ;;  %v322_v58 = vsel %vm128_vm4, %v320_v56, -inf }
 0x44d   :  { %326 = vmax.xlane.f32.xlu2 %v325_v57  ;;  %323 = vmax.xlane.f32.xlu1 %v322_v58  ;;  %v32_v58 = vld [vmem:[%s1066_s2 + $0x40] sm:$0xff] }
 0x44e   :  { %455 = vmatpush.msrb.mxu2 %v32_v58 }
 0x4c0   :  { %v324_v59 = vpop.xlane.xlu1 %323  ;;  %v327_v60 = vpop.xlane.xlu2 %326 }
 0x4c1   :  { %v328_v61 = vsub.f32 %v320_v56, %v324_v59  ;;  %v329_v62 = vsub.f32 %v321_v55, %v327_v60  ;;  %v31_v59 = vld [vmem:[%s1066_s2 + $0x38] sm:$0xff]  ;;  %v30_v60 = vld [vmem:[%s1066_s2 + $0x30] sm:$0xff] }
 0x4c2   :  { %456 = vmatpush.msrb.mxu2 %v31_v59 }
 0x4c3   :  { %v330_v63 = vmul.f32 1.442695, %v328_v61  ;;  %v332_v0 = vmul.f32 1.442695, %v329_v62  ;;  %v29_v61 = vld [vmem:[%s1066_s2 + $0x28] sm:$0xff] }
 0x4c4   :  { %457 = vmatpush.msrb.mxu2 %v30_v60 }
 0x4c5   :  { %798 = vpow2.f32 %v330_v63 }
 0x4c6   :  { %800 = vpow2.f32 %v332_v0  ;;  %458 = vmatpush.msrb.mxu2 %v29_v61 }
 0x4cb   :  { %v799_v1 = vpop.eup %798 }
 0x4cc   :  { %v801_v2 = vpop.eup %800  ;;  %v334_v3 = vsel %vm128_vm4, %v799_v1, 0.0 }
 0x4cd   :  { %335 = vadd.xlane.f32.xlu0 %v334_v3  ;;  %v337_v4 = vsel %vm128_vm4, %v801_v2, 0.0 }
 0x4ce   :  { %338 = vadd.xlane.f32.xlu1 %v337_v4 }
 0x540   :  { %v336_v8 = vpop.xlane.xlu0 %335 }
 0x541   :  { %802 = vrcp.f32 %v336_v8  ;;  %v339_v10 = vpop.xlane.xlu1 %338  ;;  %v351_v19 = vand.u32 2147483648, %v336_v8  ;;  %v349_v24 = vand.u32 2147483647, %v336_v8  ;;  %vm345_vm12 = vweird.f32 %v336_v8 }
 0x542   :  { %804 = vrcp.f32 %v339_v10  ;;  %v365_v32 = vand.u32 2147483648, %v339_v10  ;;  %vm359_vm0 = vweird.f32 %v339_v10  ;;  %v363_v37 = vand.u32 2147483647, %v339_v10 }
 0x543   :  { %806 = vrcp.f32 %v850_v11  ;;  %v352_v28 = vor.u32 1.1754944e-38, %v351_v19  ;;  %vm350_vm14 = vcmp.eq.f32.partialorder %v349_v24, 8.507059e+37 }
 0x544   :  { %v366_v39 = vor.u32 1.1754944e-38, %v365_v32  ;;  %vm364_vm5 = vcmp.eq.f32.partialorder %v363_v37, 8.507059e+37  ;;  %v40_v37 = vld [vmem:[%s1066_s2 + $0x80] sm:$0xff] }
 0x547   :  { %v803_v12 = vpop.eup %802 }
 0x548   :  { %v805_v13 = vpop.eup %804  ;;  %v341_v14 = vmul.f32 %v803_v12, %v336_v8  ;;  %vm346_vm11 = vweird.f32 %v803_v12 }
 0x549   :  { %v355_v16 = vmul.f32 %v805_v13, %v339_v10  ;;  %v807_v21 = vpop.eup %806  ;;  %vm347_vm13 = vmor %vm345_vm12, %vm346_vm11  ;;  %vm360_vm15 = vweird.f32 %v805_v13 }
 0x54a   :  { %v342_v18 = vsub.f32 1.0, %v341_v14  ;;  %v638_v29 = vmul.f32 16.0, %v807_v21  ;;  %vm361_vm3 = vmor %vm359_vm0, %vm360_vm15  ;;  %vm642_vm7 = vweird.f32 %v807_v21 }
 0x54b   :  { %v356_v20 = vsub.f32 1.0, %v355_v16 }
 0x54c   :  { %v343_v23 = vmul.f32 %v803_v12, %v342_v18  ;;  %v639_v38 = vsub.f32 1.0, %v638_v29 }
 0x54d   :  { %v357_v25 = vmul.f32 %v805_v13, %v356_v20 }
 0x54e   :  { %v344_v27 = vadd.f32 %v803_v12, %v343_v23  ;;  %v640_v42 = vmul.f32 %v807_v21, %v639_v38  ;;  %v434_v38 = vld [vmem:[%s1067_s3 + $0x6] sm:$0x1] }
 0x54f   :  { %v358_v31 = vadd.f32 %v805_v13, %v357_v25  ;;  %v784_v25 = vld [vmem:[%s1067_s3 + $0x7] ss:$0 sm:$0xff] }
 0x550   :  { %v348_v30 = vsel %vm347_vm13, %v803_v12, %v344_v27  ;;  %v641_v45 = vadd.f32 %v807_v21, %v640_v42  ;;  %v37_v42 = vld [vmem:[%s1066_s2 + $0x68] sm:$0xff] }
 0x551   :  { %v353_v33 = vsel %vm350_vm14, %v352_v28, %v348_v30  ;;  %v362_v36 = vsel %vm361_vm3, %v805_v13, %v358_v31 }
 0x552   :  { %v368_v35 = vmul.f32 %v799_v1, %v353_v33  ;;  %v367_v41 = vsel %vm364_vm5, %v366_v39, %v362_v36  ;;  %v977_v47 = vsel %vm642_vm7, %v807_v21, %v641_v45  ;;  %v39_v39 = vld [vmem:[%s1066_s2 + $0x78] sm:$0xff] }
 0x553   :  { %v369_v44 = vmul.f32 %v801_v2, %v367_v41  ;;  %v644_v48 = vmul.f32 %v977_v47, %v636_v46 }
 0x554   :  { %766 = vmatmul.msk.f32.vlgmr.msrb.gmra.mxu0 %vm128_vm4, %v368_v35 }
 0x55c   :  { %767 = vmatmul.msk.f32.gmra.mxu0 %vm128_vm4, %v369_v44 }
 0x564   :  { %776 = vmatmul.msk.f32.vlgmr.msra.gmra.mxu0 %vm78_vm1, %v644_v48 }
 0x5d1   :  { %v394_v50 = vpop.f32.mrf.mxu0 }
 0x5d2   :  { %v395_v51 = vadd.f32 %v783_v49, %v394_v50 }
 0x5d4   :  { %v400_v52 = vmul.f32 %v395_v51, %v395_v51 }
 0x5d6   :  { %v402_v53 = vsel %vm78_vm1, %v400_v52, 0.0 }
 0x5d7   :  { %403 = vadd.xlane.f32.xlu2 %v402_v53 }
 0x5d9   :  { %v397_v54 = vpop.f32.mrf.mxu0 }
 0x5da   :  { %v398_v55 = vadd.f32 %v783_v49, %v397_v54 }
 0x5dc   :  { %v401_v56 = vmul.f32 %v398_v55, %v398_v55 }
 0x5de   :  { %v405_v57 = vsel %vm78_vm1, %v401_v56, 0.0 }
 0x5df   :  { %406 = vadd.xlane.f32.xlu0 %v405_v57 }
 0x64a   :  { %v404_v62 = vpop.xlane.xlu2 %403 }
 0x64b   :  { %v408_v63 = vmax.f32 %v404_v62, 1e-24 }
 0x64d   :  { %808 = vrsqrt.f32 %v408_v63  ;;  %vm416_vm9 = vweird.f32 %v408_v63 }
 0x652   :  { %v407_v0 = vpop.xlane.xlu0 %406 }
 0x653   :  { %v809_v1 = vpop.eup %808  ;;  %v409_v2 = vmax.f32 %v407_v0, 1e-24 }
 0x654   :  { %v411_v3 = vmul.f32 %v809_v1, %v408_v63  ;;  %vm417_vm8 = vweird.f32 %v809_v1 }
 0x655   :  { %810 = vrsqrt.f32 %v409_v2  ;;  %vm418_vm10 = vmor %vm416_vm9, %vm417_vm8  ;;  %vm426_vm12 = vweird.f32 %v409_v2 }
 0x656   :  { %v412_v4 = vmul.f32 %v809_v1, %v411_v3 }
 0x658   :  { %v413_v5 = vmul.f32 0.5, %v412_v4 }
 0x65a   :  { %v414_v6 = vsub.f32 1.5, %v413_v5 }
 0x65b   :  { %v811_v7 = vpop.eup %810 }
 0x65c   :  { %v415_v8 = vmul.f32 %v809_v1, %v414_v6  ;;  %v421_v9 = vmul.f32 %v811_v7, %v409_v2  ;;  %vm427_vm11 = vweird.f32 %v811_v7 }
 0x65d   :  { %vm428_vm13 = vmor %vm426_vm12, %vm427_vm11 }
 0x65e   :  { %v419_v10 = vsel %vm418_vm10, %v809_v1, %v415_v8  ;;  %v422_v11 = vmul.f32 %v811_v7, %v421_v9 }
 0x65f   :  { %v430_v12 = vmul.f32 %v419_v10, %v395_v51 }
 0x660   :  { %v423_v13 = vmul.f32 0.5, %v422_v11 }
 0x661   :  { %v432_v14 = vmax.f32 %v430_v12, 0.0 }
 0x662   :  { %v424_v16 = vsub.f32 1.5, %v423_v13 }
 0x663   :  { %768 = vmatmul.msk.f32.vlgmr.msrb.gmra.mxu2 %vm78_vm1, %v432_v14  ;;  %v645_v21 = vsel %vm78_vm1, %v432_v14, 0.0 }
 0x664   :  { %v425_v17 = vmul.f32 %v811_v7, %v424_v16 }
 0x666   :  { %v429_v18 = vsel %vm428_vm13, %v811_v7, %v425_v17 }
 0x667   :  { %v431_v19 = vmul.f32 %v429_v18, %v398_v55 }
 0x669   :  { %v433_v20 = vmax.f32 %v431_v19, 0.0 }
 0x66b   :  { %769 = vmatmul.msk.f32.gmra.mxu2 %vm78_vm1, %v433_v20  ;;  %v646_v23 = vsel %vm78_vm1, %v433_v20, 0.0 }
 0x66c   :  { %v647_v24 = vadd.f32 %v646_v23, %v645_v21 }
 0x66e   :  { %v648_v26 = vrot.slane %v647_v24, 4 }
 0x670   :  { %v649_v29 = vadd.f32 %v648_v26, %v647_v24 }
 0x672   :  { %v650_v31 = vrot.slane %v649_v29, 2 }
 0x674   :  { %v651_v34 = vadd.f32 %v650_v31, %v649_v29  ;;  %v785_v29 = vld [vmem:[%s1067_s3 + $0x8] ss:$0 sm:$0xff] }
 0x676   :  { %v652_v36 = vrot.slane %v651_v34, 1 }
 0x678   :  { %v653_v41 = vadd.f32 %v652_v36, %v651_v34 }
 0x67a   :  { %v654_v43 = vmul.f32 %v653_v41, %v977_v47  ;;  %v44_v41 = vld [vmem:[%s1066_s2 + $0xa0] sm:$0xff] }
 0x67b   :  { %726 = vmatpush.msra.mxu2 %v44_v41 }
 0x6e6   :  { %v460_v27 = vpop.f32.mrf.mxu2 }
 0x6e7   :  { %v496_v28 = vmul.f32 %v784_v25, %v460_v27 }
 0x6e9   :  { %v498_v30 = vsel %vm78_vm1, %v496_v28, 0.0 }
 0x6ea   :  { %499 = vadd.xlane.f32.xlu1 %v498_v30 }
 0x6ee   :  { %v463_v32 = vpop.f32.mrf.mxu2 }
 0x6ef   :  { %770 = vmatpush.xpose.msk.msra.mxu1 %vm78_vm1, %v463_v32  ;;  %584 = vmatpush.msrb.mxu3 %v463_v32  ;;  %v497_v33 = vmul.f32 %v784_v25, %v463_v32 }
 0x6f1   :  { %585 = vmatpush.msrb.mxu3 %v460_v27  ;;  %v501_v35 = vsel %vm78_vm1, %v497_v33, 0.0 }
 0x6f2   :  { %502 = vadd.xlane.f32.xlu2 %v501_v35 }
 0x6f3   :  { %771 = vmatpush.xpose.msk.msra.mxu1 %vm78_vm1, %v460_v27 }
 0x6f6   :  { %772 = vmatmul.msk.f32.vlgmr.msra.gmra.mxu1 %vm78_vm1, %v434_v38 }
 0x6f7   :  { %680 = vmatpush.msrb.mxu1 %v40_v37 }
 0x6f9   :  { %681 = vmatpush.msrb.mxu1 %v39_v39 }
 0x6fb   :  { %682 = vmatpush.msrb.mxu1 %v38_v40 }
 0x6fd   :  { %683 = vmatpush.msrb.mxu1 %v37_v42  ;;  %v43_v42 = vld [vmem:[%s1066_s2 + $0x98] sm:$0xff] }
 0x6fe   :  { %775 = vmatmul.msk.f32.vlgmr.msrb.gmra.mxu1 %vm78_vm1, %v654_v43  ;;  %727 = vmatpush.msra.mxu2 %v43_v42 }
 0x75d   :  { %v500_v46 = vpop.xlane.xlu1 %499 }
 0x765   :  { %v503_v48 = vpop.xlane.xlu2 %502 }
 0x773   :  { %v492_v44 = vpop.f32.mrf.mxu1 }
 0x774   :  { %v504_v45 = vperm.slane %v492_v44, 0 }
 0x776   :  { %v505_v49 = vadd.f32 %v504_v45, %v500_v46  ;;  %v506_v50 = vadd.f32 %v504_v45, %v503_v48  ;;  %v42_v46 = vld [vmem:[%s1066_s2 + $0x90] sm:$0xff] }
 0x777   :  { %728 = vmatpush.msra.mxu2 %v42_v46 }
 0x778   :  { %vm508_vm14 = vcmp.gt.f32.partialorder %v506_v50, 0.0  ;;  %v510_v51 = vmul.f32 0.2, %v506_v50  ;;  %vm507_vm15 = vcmp.gt.f32.partialorder %v505_v49, 0.0  ;;  %v509_v52 = vmul.f32 0.2, %v505_v49 }
 0x77a   :  { %v512_v53 = vsel %vm508_vm14, %v506_v50, %v510_v51  ;;  %v511_v54 = vsel %vm507_vm15, %v505_v49, %v509_v52  ;;  %v41_v49 = vld [vmem:[%s1066_s2 + $0x88] sm:$0xff]  ;;  %vm736_vm15 = vcmask 24576  }
 0x77b   :  { %v514_v55 = vsel %vm23_vm6, %v512_v53, -1e+30  ;;  %v513_v56 = vsel %vm22_vm2, %v511_v54, -1e+30  ;;  %729 = vmatpush.msra.mxu2 %v41_v49 }
 0x77c   :  { %v518_v57 = vsel %vm128_vm4, %v514_v55, -inf  ;;  %v515_v58 = vsel %vm128_vm4, %v513_v56, -inf }
 0x77d   :  { %519 = vmax.xlane.f32.xlu1 %v518_v57  ;;  %516 = vmax.xlane.f32.xlu0 %v515_v58 }
 0x7f0   :  { %v520_v59 = vpop.xlane.xlu1 %519  ;;  %v517_v60 = vpop.xlane.xlu0 %516 }
 0x7f1   :  { %v522_v61 = vsub.f32 %v514_v55, %v520_v59  ;;  %v521_v62 = vsub.f32 %v513_v56, %v517_v60 }
 0x7f3   :  { %v525_v63 = vmul.f32 1.442695, %v522_v61  ;;  %v523_v0 = vmul.f32 1.442695, %v521_v62 }
 0x7f5   :  { %812 = vpow2.f32 %v525_v63 }
 0x7f6   :  { %814 = vpow2.f32 %v523_v0 }
 0x7fb   :  { %v813_v1 = vpop.eup %812 }
 0x7fc   :  { %v815_v22 = vpop.eup %814  ;;  %v530_v2 = vsel %vm128_vm4, %v813_v1, 0.0 }
 0x7fd   :  { %531 = vadd.xlane.f32.xlu0 %v530_v2  ;;  %v527_v15 = vsel %vm128_vm4, %v815_v22, 0.0 }
 0x7fe   :  { %528 = vadd.xlane.f32.xlu2 %v527_v15 }
 0x870   :  { %v532_v3 = vpop.xlane.xlu0 %531 }
 0x871   :  { %v529_v4 = vpop.xlane.xlu2 %528  ;;  %816 = vrcp.f32 %v532_v3  ;;  %v558_v20 = vand.u32 2147483648, %v532_v3  ;;  %vm552_vm7 = vweird.f32 %v532_v3  ;;  %v556_v23 = vand.u32 2147483647, %v532_v3 }
 0x872   :  { %818 = vrcp.f32 %v529_v4  ;;  %v544_v11 = vand.u32 2147483648, %v529_v4  ;;  %v542_v13 = vand.u32 2147483647, %v529_v4  ;;  %vm538_vm6 = vweird.f32 %v529_v4 }
 0x873   :  { %v559_v26 = vor.u32 1.1754944e-38, %v558_v20  ;;  %vm557_vm9 = vcmp.eq.f32.partialorder %v556_v23, 8.507059e+37 }
 0x874   :  { %v545_v17 = vor.u32 1.1754944e-38, %v544_v11  ;;  %vm543_vm3 = vcmp.eq.f32.partialorder %v542_v13, 8.507059e+37 }
 0x877   :  { %v817_v5 = vpop.eup %816 }
 0x878   :  { %v819_v6 = vpop.eup %818  ;;  %v548_v7 = vmul.f32 %v817_v5, %v532_v3  ;;  %vm553_vm5 = vweird.f32 %v817_v5 }
 0x879   :  { %v534_v8 = vmul.f32 %v819_v6, %v529_v4  ;;  %vm539_vm2 = vweird.f32 %v819_v6  ;;  %vm554_vm8 = vmor %vm552_vm7, %vm553_vm5 }
 0x87a   :  { %v549_v9 = vsub.f32 1.0, %v548_v7  ;;  %vm540_vm0 = vmor %vm538_vm6, %vm539_vm2 }
 0x87b   :  { %v535_v10 = vsub.f32 1.0, %v534_v8 }
 0x87c   :  { %v550_v14 = vmul.f32 %v817_v5, %v549_v9  ;;  %v685_v9 = vpop.f32.mrf.mxu1 }
 0x87d   :  { %v536_v12 = vmul.f32 %v819_v6, %v535_v10  ;;  %v708_v10 = vpop.f32.mrf.mxu0 }
 0x87e   :  { %v551_v18 = vadd.f32 %v817_v5, %v550_v14  ;;  %v709_v11 = vadd.f32 %v708_v10, %v685_v9 }
 0x87f   :  { %v537_v16 = vadd.f32 %v819_v6, %v536_v12  ;;  %v627_v12 = vld [vmem:[%s1067_s3 + $0x9] sm:$0x1] }
 0x880   :  { %v555_v25 = vsel %vm554_vm8, %v817_v5, %v551_v18 }
 0x881   :  { %v541_v19 = vsel %vm540_vm0, %v819_v6, %v537_v16  ;;  %v560_v27 = vsel %vm557_vm9, %v559_v26, %v555_v25 }
 0x882   :  { %v546_v21 = vsel %vm543_vm3, %v545_v17, %v541_v19  ;;  %v562_v28 = vmul.f32 %v813_v1, %v560_v27 }
 0x883   :  { %v561_v24 = vmul.f32 %v815_v22, %v546_v21 }
 0x885   :  { %773 = vmatmul.msk.f32.vlgmr.msrb.gmra.mxu3 %vm128_vm4, %v561_v24 }
 0x88d   :  { %774 = vmatmul.msk.f32.gmra.mxu3 %vm128_vm4, %v562_v28 }
 0x908   :  { %v587_v30 = vpop.f32.mrf.mxu3 }
 0x909   :  { %v588_v31 = vadd.f32 %v785_v29, %v587_v30 }
 0x90b   :  { %v593_v32 = vmul.f32 %v588_v31, %v588_v31 }
 0x90d   :  { %v595_v33 = vsel %vm78_vm1, %v593_v32, 0.0 }
 0x90e   :  { %596 = vadd.xlane.f32.xlu1 %v595_v33 }
 0x910   :  { %v590_v34 = vpop.f32.mrf.mxu3 }
 0x911   :  { %v591_v35 = vadd.f32 %v785_v29, %v590_v34 }
 0x913   :  { %v594_v37 = vmul.f32 %v591_v35, %v591_v35 }
 0x915   :  { %v598_v38 = vsel %vm78_vm1, %v594_v37, 0.0 }
 0x916   :  { %599 = vadd.xlane.f32.xlu2 %v598_v38 }
 0x981   :  { %v597_v36 = vpop.xlane.xlu1 %596 }
 0x982   :  { %v601_v39 = vmax.f32 %v597_v36, 1e-24 }
 0x984   :  { %820 = vrsqrt.f32 %v601_v39  ;;  %vm609_vm10 = vweird.f32 %v601_v39 }
 0x989   :  { %v600_v40 = vpop.xlane.xlu2 %599 }
 0x98a   :  { %v821_v43 = vpop.eup %820  ;;  %v602_v44 = vmax.f32 %v600_v40, 1e-24 }
 0x98b   :  { %v604_v45 = vmul.f32 %v821_v43, %v601_v39  ;;  %vm610_vm4 = vweird.f32 %v821_v43 }
 0x98c   :  { %822 = vrsqrt.f32 %v602_v44  ;;  %vm611_vm11 = vmor %vm609_vm10, %vm610_vm4  ;;  %vm619_vm13 = vweird.f32 %v602_v44 }
 0x98d   :  { %v605_v48 = vmul.f32 %v821_v43, %v604_v45 }
 0x98f   :  { %v606_v50 = vmul.f32 0.5, %v605_v48 }
 0x991   :  { %v607_v51 = vsub.f32 1.5, %v606_v50 }
 0x992   :  { %v823_v52 = vpop.eup %822 }
 0x993   :  { %v608_v53 = vmul.f32 %v821_v43, %v607_v51  ;;  %v614_v54 = vmul.f32 %v823_v52, %v602_v44  ;;  %vm620_vm12 = vweird.f32 %v823_v52 }
 0x994   :  { %vm621_vm14 = vmor %vm619_vm13, %vm620_vm12 }
 0x995   :  { %v615_v55 = vmul.f32 %v823_v52, %v614_v54  ;;  %v612_v56 = vsel %vm611_vm11, %v821_v43, %v608_v53 }
 0x996   :  { %v623_v59 = vmul.f32 %v612_v56, %v588_v31 }
 0x997   :  { %v616_v57 = vmul.f32 0.5, %v615_v55 }
 0x998   :  { %v625_v62 = vmax.f32 %v623_v59, 0.0 }
 0x999   :  { %v617_v58 = vsub.f32 1.5, %v616_v57 }
 0x99a   :  { %v655_v1 = vsel %vm78_vm1, %v625_v62, 0.0 }
 0x99b   :  { %v618_v60 = vmul.f32 %v823_v52, %v617_v58 }
 0x99d   :  { %v622_v61 = vsel %vm621_vm14, %v823_v52, %v618_v60 }
 0x99e   :  { %v624_v63 = vmul.f32 %v622_v61, %v591_v35 }
 0x9a0   :  { %v626_v0 = vmax.f32 %v624_v63, 0.0 }
 0x9a2   :  { %v656_v22 = vsel %vm78_vm1, %v626_v0, 0.0 }
 0x9a3   :  { %v657_v2 = vadd.f32 %v656_v22, %v655_v1 }
 0x9a5   :  { %v658_v15 = vrot.slane %v657_v2, 4 }
 0x9a7   :  { %v659_v3 = vadd.f32 %v658_v15, %v657_v2 }
 0x9a9   :  { %v660_v4 = vrot.slane %v659_v3, 2 }
 0x9ab   :  { %v661_v5 = vadd.f32 %v660_v4, %v659_v3 }
 0x9ad   :  { %v662_v6 = vrot.slane %v661_v5, 1 }
 0x9af   :  { %v663_v7 = vadd.f32 %v662_v6, %v661_v5 }
 0x9b1   :  { %v664_v8 = vmul.f32 %v663_v7, %v977_v47 }
 0x9b3   :  { %777 = vmatmul.msk.f32.vlgmr.msra.gmra.mxu2 %vm78_vm1, %v664_v8 }
 0xa36   :  { %v731_v13 = vpop.f32.mrf.mxu2 }
 0xa37   :  { %v734_v14 = vadd.f32 %v731_v13, %v709_v11 }
 0xa39   :  { %v735_v16 = vadd.f32 %v734_v14, %v627_v12 }
 0xa3b   :  { %737 = vst.msk [vmem:[#allocation2] sm:$0x1] %vm736_vm15, %v735_v16 }
 0xa3c   :  { %748 = dma.vmem_to_hbm [thread:$0]  %s744_s1, 16, %s746_s30, [#allocation3]  }
 0xa3d   :  { %848 = dma.done.wait [#allocation3], 16  }
 0xa3e   :  { %849 = vsyncadd [#allocation3], 4294967280 }
 0xa3f   :  { %753 = vsyncpa [#allocation3], 1 }

</bundles_post_ra>
